<compile_context>
chip_gen: v7x
topology: tpu7x:2x2x1
jax: 0.10.0
libtpu: 0.0.40
codegen_flags: <defaults>
</compile_context>

<pallas_src>
import functools

import jax
import jax.numpy as jnp
from jax.experimental import pallas as pl
from jax.experimental.pallas import tpu as pltpu


def _round_up(x, m):
    return ((x + m - 1) // m) * m


# ----------------------------------------------------------------------------
# Pallas kernels: fused matmul + BN scale/bias + activation (+ skip)
# ----------------------------------------------------------------------------
def _epilogue(acc, s_ref, b_ref, activation):
    acc = acc * s_ref[...] + b_ref[...]          # f32 epilogue (v5e-safe)
    if activation == "relu":
        acc = jnp.maximum(acc, 0.0)
    elif activation == "tanh":
        acc = jnp.tanh(acc)
    return acc


def _mm_bn_act_kernel(x_ref, w_ref, s_ref, b_ref, o_ref, *, activation):
    acc = jnp.dot(x_ref[...], w_ref[...], preferred_element_type=jnp.float32)
    acc = _epilogue(acc, s_ref, b_ref, activation)
    o_ref[...] = acc.astype(o_ref.dtype)


def _mm_bn_act_skip_kernel(x_ref, w_ref, s_ref, b_ref, skip_ref, o_ref, *,
                           activation):
    acc = jnp.dot(x_ref[...], w_ref[...], preferred_element_type=jnp.float32)
    acc = _epilogue(acc, s_ref, b_ref, activation)
    acc = acc + skip_ref[...].astype(jnp.float32)   # residual AFTER activation
    o_ref[...] = acc.astype(o_ref.dtype)


# ----------------------------------------------------------------------------
# Tile selection
# ----------------------------------------------------------------------------
def _choose_tiles(M, N_pad):
    """Pick (tm, tn): lane-dense tn, acc <= ~32 vregs, >=2 grid units."""
    if N_pad % 512 == 0:
        tn = 512
    elif N_pad % 256 == 0:
        tn = 256
    else:
        tn = 128                      # N_pad is always a multiple of 128
    tm = 32768 // tn                  # (tm, tn) f32 accumulator <= 32 vregs
    # Ensure >= 2 independent grid units for v7x's two TensorCores.
    if (N_pad // tn) * ((M + tm - 1) // tm) < 2 and tn > 128:
        tn //= 2
        tm = 32768 // tn
    return tm, tn


# ----------------------------------------------------------------------------
# Conv 3x3 + BN + activation (+ optional fused residual skip)
# ----------------------------------------------------------------------------
def conv3x3_bn_act(x, w, scale, bias, activation, skip=None,
                   out_dtype=jnp.bfloat16):
    """x: (B,H,W,Cin) NHWC; w: (3,3,Cin,Cout) HWIO; scale/bias: (Cout,).

    Optional `skip` (B,H,W,Cout) is added after the activation (fused).
    Returns (B,H,W,Cout) in `out_dtype`.
    """
    B, H, W, Cin = x.shape
    Cout = w.shape[-1]
    K = 9 * Cin
    M = B * H * W

    K_pad = _round_up(K, 128)
    N_pad = _round_up(Cout, 128)
    tm, tn = _choose_tiles(M, N_pad)
    M_pad = _round_up(M, tm)

    # im2col in the wrapper: tap order (dy, dx, cin) matches w.reshape(9*Cin, Cout).
    x_bf = x.astype(jnp.bfloat16)
    x_padded = jnp.pad(x_bf, ((0, 0), (1, 1), (1, 1), (0, 0)))
    taps = [x_padded[:, dy:dy + H, dx:dx + W, :]
            for dy in range(3) for dx in range(3)]
    x_col = jnp.concatenate(taps, axis=-1).reshape(M, K)
    x_col = jnp.pad(x_col, ((0, M_pad - M), (0, K_pad - K)))

    w_mat = jnp.pad(w.reshape(K, Cout).astype(jnp.bfloat16),
                    ((0, K_pad - K), (0, N_pad - Cout)))
    s_row = jnp.pad(scale.astype(jnp.float32), (0, N_pad - Cout)).reshape(1, N_pad)
    b_row = jnp.pad(bias.astype(jnp.float32), (0, N_pad - Cout)).reshape(1, N_pad)

    # Grid: Cout tiles outer, M tiles innermost -> weight tile block index is
    # constant across consecutive steps (no per-step weight re-DMA).
    in_specs = [
        pl.BlockSpec((tm, K_pad), lambda n, m: (m, 0)),
        pl.BlockSpec((K_pad, tn), lambda n, m: (0, n)),
        pl.BlockSpec((1, tn), lambda n, m: (0, n)),
        pl.BlockSpec((1, tn), lambda n, m: (0, n)),
    ]
    inputs = [x_col, w_mat, s_row, b_row]
    skip_bytes = 0

    if skip is not None:
        skip_flat = jnp.pad(skip.astype(jnp.bfloat16).reshape(M, Cout),
                            ((0, M_pad - M), (0, N_pad - Cout)))
        in_specs.append(pl.BlockSpec((tm, tn), lambda n, m: (m, n)))
        inputs.append(skip_flat)
        skip_bytes = skip_flat.size * 2
        kernel = functools.partial(_mm_bn_act_skip_kernel, activation=activation)
    else:
        kernel = functools.partial(_mm_bn_act_kernel, activation=activation)

    out_bytes_per_elem = 4 if out_dtype == jnp.float32 else 2
    cost = pl.CostEstimate(
        flops=2 * M_pad * K_pad * N_pad,
        transcendentals=(M_pad * N_pad) if activation == "tanh" else 0,
        bytes_accessed=(x_col.size * 2 + w_mat.size * 2
                        + s_row.size * 4 + b_row.size * 4
                        + M_pad * N_pad * out_bytes_per_elem + skip_bytes),
    )

    out = pl.pallas_call(
        kernel,
        out_shape=jax.ShapeDtypeStruct((M_pad, N_pad), out_dtype),
        grid_spec=pltpu.PrefetchScalarGridSpec(
            num_scalar_prefetch=0,
            grid=(N_pad // tn, M_pad // tm),
            in_specs=in_specs,
            out_specs=pl.BlockSpec((tm, tn), lambda n, m: (m, n)),
        ),
        compiler_params=pltpu.CompilerParams(
            dimension_semantics=("parallel", "parallel"),
            vmem_limit_bytes=32 * 1024 * 1024,   # > v5e 16 MiB default; < v7x 64 MiB
        ),
        cost_estimate=cost,
    )(*inputs)

    return out[:M, :Cout].reshape(B, H, W, Cout)


# ----------------------------------------------------------------------------
# PixelShuffle (PyTorch channel ordering), NHWC layout -- plain-JAX glue; XLA
# fuses it with the adjacent residual add and the next layer's im2col.
# ----------------------------------------------------------------------------
def pixel_shuffle_nhwc(x, r):
    B, H, W, C = x.shape
    Co = C // (r * r)
    x = x.reshape(B, H, W, Co, r, r)
    x = jnp.transpose(x, (0, 1, 4, 2, 5, 3))
    return x.reshape(B, H * r, W * r, Co)


# ----------------------------------------------------------------------------
# Deterministic parameter construction (Conv + eval-mode BatchNorm folded)
# ----------------------------------------------------------------------------
def init_conv_bn(key, cin, cout, with_bn=True):
    k1, k2, k3, k4, k5, k6 = jax.random.split(key, 6)
    w = jax.random.normal(k1, (3, 3, cin, cout), jnp.float32) * (
        0.05 / jnp.sqrt(9.0 * cin))
    b = jax.random.normal(k2, (cout,), jnp.float32) * 0.01
    if with_bn:
        gamma = 1.0 + 0.1 * jax.random.normal(k3, (cout,), jnp.float32)
        beta = 0.05 * jax.random.normal(k4, (cout,), jnp.float32)
        mean = 0.05 * jax.random.normal(k5, (cout,), jnp.float32)
        var = 1.0 + 0.1 * jnp.abs(jax.random.normal(k6, (cout,), jnp.float32))
        eps = 1e-5
        s = gamma / jnp.sqrt(var + eps)
        eff_scale = s
        eff_bias = s * b + beta - s * mean   # BN(conv + b) folded
    else:
        eff_scale = jnp.ones((cout,), jnp.float32)
        eff_bias = b
    return w, eff_scale, eff_bias


# ----------------------------------------------------------------------------
# Decoder forward (attention=False path, eval mode)
# ----------------------------------------------------------------------------
def decoder_forward(x_nchw, skip_features_nchw, params):
    to_nhwc = lambda t: jnp.transpose(t, (0, 2, 3, 1))
    to_nchw = lambda t: jnp.transpose(t, (0, 3, 1, 2))

    x = to_nhwc(x_nchw)
    skips = [to_nhwc(s).astype(jnp.bfloat16) if s is not None else None
             for s in skip_features_nchw]

    # decode1: Conv(latent,512)+BN+ReLU ; + skip[4]  (skip fused in kernel)
    w, s, b = params["decode1"]
    x = conv3x3_bn_act(x, w, s, b, "relu", skip=skips[4])

    # decode2: Conv(512,1024)+BN+ReLU+PixelShuffle(2) ; + skip[2]
    w, s, b = params["decode2"]
    x = conv3x3_bn_act(x, w, s, b, "relu")
    x = pixel_shuffle_nhwc(x, 2) + skips[2]

    # decode3: Conv(256,512)+BN+ReLU+PixelShuffle(2) ; + skip[1]
    w, s, b = params["decode3"]
    x = conv3x3_bn_act(x, w, s, b, "relu")
    x = pixel_shuffle_nhwc(x, 2) + skips[1]

    # decode4: Conv(128,256)+BN+ReLU+PixelShuffle(2) ; + skip[0]
    w, s, b = params["decode4"]
    x = conv3x3_bn_act(x, w, s, b, "relu")
    x = pixel_shuffle_nhwc(x, 2) + skips[0]

    # decode5: Conv(64,12)+BN+ReLU+PixelShuffle(2)   (Cout padded to 128 lanes)
    w, s, b = params["decode5"]
    x = conv3x3_bn_act(x, w, s, b, "relu")
    x = pixel_shuffle_nhwc(x, 2)

    # final: Conv(3,3) + Tanh                        (Cout padded to 128 lanes)
    w, s, b = params["final"]
    x = conv3x3_bn_act(x, w, s, b, "tanh", out_dtype=jnp.float32)

    return to_nchw(x)


# ----------------------------------------------------------------------------
if __name__ == "__main__":
    key = jax.random.PRNGKey(0)
    keys = jax.random.split(key, 12)

    latent_dim = 32
    B, H, W = 2, 4, 4

    params = {
        "decode1": init_conv_bn(keys[0], latent_dim, 512),
        "decode2": init_conv_bn(keys[1], 512, 1024),
        "decode3": init_conv_bn(keys[2], 256, 512),
        "decode4": init_conv_bn(keys[3], 128, 256),
        "decode5": init_conv_bn(keys[4], 64, 12),
        "final":   init_conv_bn(keys[5], 3, 3, with_bn=False),
    }

    x = jax.random.normal(keys[6], (B, latent_dim, H, W), jnp.float32)
    skip_features = [
        jax.random.normal(keys[7], (B, 64, 8 * H, 8 * W), jnp.float32),   # [0]
        jax.random.normal(keys[8], (B, 128, 4 * H, 4 * W), jnp.float32),  # [1]
        jax.random.normal(keys[9], (B, 256, 2 * H, 2 * W), jnp.float32),  # [2]
        None,                                                             # [3] unused
        jax.random.normal(keys[10], (B, 512, H, W), jnp.float32),         # [4]
    ]

    out = decoder_forward(x, skip_features, params)
    out = jax.block_until_ready(out)
    assert out.shape == (B, 3, 16 * H, 16 * W), out.shape
    assert bool(jnp.all(jnp.isfinite(out)))
    print("KERNEL_OK")
</pallas_src>

<mosaic_0001>
module attributes {stable_mosaic.version = 11 : i64} {
  func.func @_mm_bn_act_skip_kernel(%arg0: i32, %arg1: i32, %arg2: memref<128x384xbf16, #tpu.memory_space<vmem>>, %arg3: memref<384x256xbf16, #tpu.memory_space<vmem>>, %arg4: memref<1x256xf32, #tpu.memory_space<vmem>>, %arg5: memref<1x256xf32, #tpu.memory_space<vmem>>, %arg6: memref<128x256xbf16, #tpu.memory_space<vmem>>, %arg7: memref<128x256xbf16, #tpu.memory_space<vmem>>) attributes {dimension_semantics = [#tpu.dimension_semantics<parallel>, #tpu.dimension_semantics<parallel>], iteration_bounds = array<i64: 2, 1>, scalar_prefetch = 0 : i64, scratch_operands = 0 : i64, tpu.core_type = #tpu.core_type<tc>, window_params = [{transform_indices = @transform_0, window_bounds = array<i64: 128, 384>}, {transform_indices = @transform_1, window_bounds = array<i64: 384, 256>}, {transform_indices = @transform_2, window_bounds = array<i64: 1, 256>}, {transform_indices = @transform_3, window_bounds = array<i64: 1, 256>}, {transform_indices = @transform_4, window_bounds = array<i64: 128, 256>}, {transform_indices = @transform_5, window_bounds = array<i64: 128, 256>}]} {
    %c0 = arith.constant 0 : index
    %c0_0 = arith.constant 0 : index
    %0 = vector.load %arg2[%c0, %c0_0] : memref<128x384xbf16, #tpu.memory_space<vmem>>, vector<128x384xbf16>
    %c0_1 = arith.constant 0 : index
    %c0_2 = arith.constant 0 : index
    %1 = vector.load %arg3[%c0_1, %c0_2] : memref<384x256xbf16, #tpu.memory_space<vmem>>, vector<384x256xbf16>
    %cst = arith.constant dense<0.000000e+00> : vector<128x256xf32>
    %2 = tpu.matmul %0, %1, %cst {dimension_numbers = #tpu.dot_dimension_numbers<[1], [0], [0], [1], [0, 0, 1, 1], [], []>} : vector<128x384xbf16>, vector<384x256xbf16>, vector<128x256xf32> -> vector<128x256xf32>
    %c0_3 = arith.constant 0 : index
    %c0_4 = arith.constant 0 : index
    %3 = vector.load %arg4[%c0_3, %c0_4] : memref<1x256xf32, #tpu.memory_space<vmem>>, vector<1x256xf32>
    %4 = vector.broadcast %3 : vector<1x256xf32> to vector<128x256xf32>
    %5 = arith.mulf %2, %4 : vector<128x256xf32>
    %c0_5 = arith.constant 0 : index
    %c0_6 = arith.constant 0 : index
    %6 = vector.load %arg5[%c0_5, %c0_6] : memref<1x256xf32, #tpu.memory_space<vmem>>, vector<1x256xf32>
    %7 = vector.broadcast %6 : vector<1x256xf32> to vector<128x256xf32>
    %8 = arith.addf %5, %7 : vector<128x256xf32>
    %cst_7 = arith.constant 0.000000e+00 : f32
    %9 = vector.broadcast %cst_7 : f32 to vector<128x256xf32>
    %10 = arith.maximumf %8, %9 : vector<128x256xf32>
    %c0_8 = arith.constant 0 : index
    %c0_9 = arith.constant 0 : index
    %11 = vector.load %arg6[%c0_8, %c0_9] : memref<128x256xbf16, #tpu.memory_space<vmem>>, vector<128x256xbf16>
    %12 = arith.extf %11 : vector<128x256xbf16> to vector<128x256xf32>
    %13 = arith.addf %10, %12 : vector<128x256xf32>
    %14 = arith.truncf %13 : vector<128x256xf32> to vector<128x256xbf16>
    %c0_10 = arith.constant 0 : index
    %c0_11 = arith.constant 0 : index
    %15 = vector.load %arg7[%c0_10, %c0_11] : memref<128x256xbf16, #tpu.memory_space<vmem>>, vector<128x256xbf16>
    tpu.vector_store %arg7[%c0_10, %c0_11], %14 {strides = array<i32>} : memref<128x256xbf16, #tpu.memory_space<vmem>>, vector<128x256xbf16>,
    return
  }
  func.func @transform_0(%arg0: i32, %arg1: i32) -> (i32, i32) {
    %c0_i32 = arith.constant 0 : i32
    %c0_i32_0 = arith.constant 0 : i32
    return %arg1, %c0_i32 : i32, i32
  }
  func.func @transform_1(%arg0: i32, %arg1: i32) -> (i32, i32) {
    %c0_i32 = arith.constant 0 : i32
    %c0_i32_0 = arith.constant 0 : i32
    return %c0_i32, %arg0 : i32, i32
  }
  func.func @transform_2(%arg0: i32, %arg1: i32) -> (i32, i32) {
    %c0_i32 = arith.constant 0 : i32
    %c0_i32_0 = arith.constant 0 : i32
    return %c0_i32, %arg0 : i32, i32
  }
  func.func @transform_3(%arg0: i32, %arg1: i32) -> (i32, i32) {
    %c0_i32 = arith.constant 0 : i32
    %c0_i32_0 = arith.constant 0 : i32
    return %c0_i32, %arg0 : i32, i32
  }
  func.func @transform_4(%arg0: i32, %arg1: i32) -> (i32, i32) {
    %c0_i32 = arith.constant 0 : i32
    return %arg1, %arg0 : i32, i32
  }
  func.func @transform_5(%arg0: i32, %arg1: i32) -> (i32, i32) {
    %c0_i32 = arith.constant 0 : i32
    return %arg1, %arg0 : i32, i32
  }
}

</mosaic_0001>

<bundles_post_ra>
// kernel: tpu_custom_call.1
= control target key start
LH: loop header
LB: loop body
LE: loop exit
PB: predicated region body
PF: predicated region fallthrough
CT: control target
= control target key end

     0   :  { %s2605_s0 = inlined_call_operand.hbm [shape: bf16[128,384], index: 0, kind: input, shape index: {}]   ;;  %s2606_s1 = inlined_call_operand.hbm [shape: bf16[384,512], index: 1, kind: input, shape index: {}]   ;;  %s2607_s2 = inlined_call_operand.vmem [shape: f32[1,512], index: 2, kind: input, shape index: {}]   ;;  %s2608_s3 = inlined_call_operand.vmem [shape: f32[1,512], index: 3, kind: input, shape index: {}]   ;;  %s2609_s4 = inlined_call_operand.hbm [shape: bf16[128,512], index: 4, kind: input, shape index: {}]   ;;  %s2610_s5 = inlined_call_operand.hbm [shape: bf16[128,512], index: 5, kind: output, shape index: {}]  }
   0x1   :  { %2618 = sst [smem:[#allocation12_spill]] %s2606_s1 }
   0x2   :  { %10 = vsyncpa [#allocation3], 0 }
   0x3   :  { %11 = vsyncpa [#allocation6], 0 }
   0x4   :  { %13 = vsyncpa [#allocation6 + $0x1], 0 }
   0x5   :  { %14 = vsyncpa [#allocation4], 0 }
   0x6   :  { %16 = vsyncpa [#allocation4 + $0x1], 0  ;;  %s2082_s18 = smov 0   ;;  %s2084_s19 = smov 0  }
   0x7   :  { %s2086_s20 = smov 0   ;;  %s2088_s21 = smov 0  }
   0x8   :  { %s2090_s22 = smov 0   ;;  %s2092_s23 = smov 0  }
   0x9 LB: > { %s34_s24 = sadd.s32 1, %s2033_s22  ;;  %s67_s25 = sadd.s32 1, %s2025_s20  ;;  %s2037_s23 = sphi %s2092_s23, %s22_s23   ;;  %s2033_s22 = sphi %s2090_s22, %s2642_s22   ;;  %s2029_s21 = sphi %s2088_s21, %s2641_s21   ;;  %s2025_s20 = sphi %s2086_s20, %s2640_s20   ;;  %s2021_s19 = sphi %s2084_s19, %s2639_s19   ;;  %s2017_s18 = sphi %s2082_s18, %s2638_s18  }
   0xa   : > { %p36_p0 = scmp.ge.s32.totalorder %s34_s24, 2  ;;  %p74_p1 = scmp.ne.s32.totalorder %s2025_s20, %s2021_s19 }
   0xb   : > { %p75_p2 = scmp.eq.s32.totalorder %s2037_s23, 0  ;;  %p1698_p5 = scmp.lt.s32.totalorder %s2037_s23, 2 }
   0xc   : > { %s2644_s24 = smov (%p36_p0, %s34_s24), 0  ;;  %s229_s27 = sand.u32 1, %s2037_s23  }
   0xd   : > { %p76_p4 = por %p75_p2, %p74_p1  ;;  %s64_s26 = ssub.s32 %s2033_s22, %s2644_s24 }
   0xe   : > { %p65_p6 = scmp.eq.s32.totalorder %s64_s26, 0  ;;  %s231_s28 = sand.u32 1, %s2025_s20  }
   0xf   : > { %s1619_s29 = sshll.u32 %s2033_s22, 7  ;;  %s1670_s6 = smul.u32 384, %s231_s28 }
  0x10   : > { %s2130_s30 = scalar_select %p65_p6, %s2025_s20, %s67_s25  }
  0x11   : > { %s2619_s1 = sld [smem:[#allocation12_spill]]  ;;  %p2141_p7 = pnand %p1698_p5, %p76_p4 }
  0x12   : > { %s233_s11 = scalar_lea.vmem [#allocation5], %s1670_s6  ;;  %s2147_s13 = scalar_lea.sflag [#allocation6], %s229_s27 }
  0x13   : > { %s240_s12 = sshll.u32 %s233_s11, 4  ;;  %p1865_p9 = pneg %p2141_p7  ;;  %s2145_s12 = int_to_ptr.vmem [resolvable:$true] %s240_s12 }
  0x17   : > { %s2139_s9 = scalar_lea.hbm %s2619_s1, %s1619_s29  ;;  %s1868_s17 = scalar_lea.hbm %s2619_s1, 12288 }
  0x18   : > { %s1863_s14 = scalar_lea.hbm %s2139_s9, 6144  ;;  %p1869_p12 = scmp.lt.u32.totalorder %s2139_s9, %s2619_s1 }
  0x19   : > { %p1864_p8 = scmp.ne.s32.totalorder %s2139_s9, %s1863_s14  ;;  %p1870_p13 = scmp.lt.u32.totalorder %s1868_s17, %s1863_s14 }
  0x1a   : > { %p1872_p2 = scmp.lt.u32.totalorder %s1863_s14, %s2139_s9 }
  0x1b   : > { %p1866_p10 = pnand %p1865_p9, %p1864_p8  ;;  %p1871_p0 = por %p1870_p13, %p1869_p12 }
  0x1d   : > { %p1867_p11 = pneg %p1866_p10  ;;  %p1873_p4 = por %p1872_p2, %p1871_p0 }
  0x1f   : > { %p1874_p5 = pnand %p1873_p4, %p1867_p11 }
  0x21   : > { %1877 = shalt.err (!%p1874_p5)
}
  0x22   : > { %s1878_s27 = scalar_lea.vmem %s2145_s12, 6144  ;;  %s2039_s6 = smov [#allocation5]  }
  0x23   : > { %p1879_p6 = scmp.ne.s32.totalorder %s2145_s12, %s1878_s27  ;;  %s1883_s7 = sshll.u32 %s2039_s6, 4  ;;  %s1884_s7 = int_to_ptr.vmem [resolvable:$false] %s1883_s7 }
  0x24   : > { %s1885_s8 = scalar_lea.vmem %s1884_s7, 12288  ;;  %p1886_p3 = scmp.lt.s32.totalorder %s2145_s12, %s1884_s7 }
  0x25   : > { %p1881_p8 = pnand %p1879_p6, %p1865_p9  ;;  %p1887_p12 = scmp.lt.s32.totalorder %s1885_s8, %s1878_s27 }
  0x27   : > { %p1882_p10 = pneg %p1881_p8  ;;  %p1888_p13 = por %p1887_p12, %p1886_p3 }
  0x29   : > { %p1889_p0 = pnand %p1888_p13, %p1882_p10 }
  0x2b   : > { %1892 = shalt.err (!%p1889_p0)
}
  0x2c   : > { %s2611_s11 = smov 256   ;;  %s2612_s14 = smov 128  }
  0x2d   : > { %s2613_s15 = smov 8   ;;  %s1517_s16 = sshll.u32 %s231_s28, 7 }
  0x2e   : > { %1689 = dma.hbm_to_vmem [thread:$0]  (!%p2141_p7), %s2139_s9, 6144, %s2145_s12, %s2147_s13, %s2611_s11, %s2612_s14, %s2613_s15  }
  0x2f   : > { %s2185_s26 = scalar_lea.hbm %s2609_s4, %s1619_s29  ;;  %s2188_s27 = sadd.s32 4294967295, %s2037_s23  }
  0x30   : > { %s1511_s6 = sadd.s32 4294967294, %s2037_s23   ;;  %p80_p3 = scmp.ne.s32.totalorder %s2021_s19, %s2017_s18 }
  0x31   : > { %p2614_p11 = scmp.eq.s32.totalorder %s2188_s27, 0  ;;  %p186_p2 = scmp.eq.s32.totalorder %s2188_s27, 1 }
  0x32   : > { %p192_p4 = scmp.eq.s32.totalorder %s1511_s6, 1  ;;  %p1512_p6 = scmp.ge.s32.totalorder %s2037_s23, 1 }
  0x33   : > { %p2197_p5 = por %p2614_p11, %p80_p3  ;;  %p2205_p8 = por %p186_p2, %p74_p1 }
  0x34   : > { %p2209_p10 = por %p192_p4, %p80_p3  ;;  %p199_p12 = scmp.lt.s32.totalorder %s2037_s23, 3 }
  0x35   : > { %s2621_s28 = scalar_select %p2197_p5, 1, 0 }
  0x36   : > { %s2622_s29 = scalar_select %p2205_p8, 1, 0 }
  0x37   : > { %s2623_s9 = scalar_select %p2209_p10, 1, 0 }
  0x38   : > { %s270_s12 = scalar_lea.vmem [#allocation7], %s1517_s16  ;;  %p2214_p13 = pnand %p1512_p6, %p199_p12 }
  0x39   : > { %s280_s7 = sshll.u32 %s270_s12, 4  ;;  %s2043_s17 = smov [#allocation2]   ;;  %s2222_s7 = int_to_ptr.vmem [resolvable:$true] %s280_s7 }
  0x3a   : > { %s2624_s8 = scalar_select %p2214_p13, 1, 0 }
  0x3b   : > { %s215_s25 = sshll.u32 %s2043_s17, 4  ;;  %s1893_s6 = scalar_lea.hbm %s2185_s26, 2048  ;;  %s2218_s25 = int_to_ptr.vmem [resolvable:$true] %s215_s25 }
  0x3c   : > { %p1894_p0 = scmp.ne.s32.totalorder %s2185_s26, %s1893_s6  ;;  %s1898_s11 = scalar_lea.hbm %s2609_s4, 4096 }
  0x3d   : > { %p1899_p4 = scmp.lt.u32.totalorder %s2185_s26, %s2609_s4  ;;  %p1900_p6 = scmp.lt.u32.totalorder %s1898_s11, %s1893_s6 }
  0x3e   : > { %p1896_p3 = pnand %p1894_p0, %p1865_p9  ;;  %p1902_p11 = scmp.lt.u32.totalorder %s1893_s6, %s2185_s26 }
  0x3f   : > { %p1901_p12 = por %p1900_p6, %p1899_p4 }
  0x40   : > { %p1897_p2 = pneg %p1896_p3 }
  0x41   : > { %p1903_p1 = por %p1902_p11, %p1901_p12 }
  0x43   : > { %p1904_p10 = pnand %p1903_p1, %p1897_p2 }
  0x45   : > { %1907 = shalt.err (!%p1904_p10)
}
  0x46   : > { %s1908_s17 = scalar_lea.vmem %s2222_s7, 2048  ;;  %s2044_s16 = smov [#allocation7]  }
  0x47   : > { %p1909_p0 = scmp.ne.s32.totalorder %s2222_s7, %s1908_s17  ;;  %s1913_s12 = sshll.u32 %s2044_s16, 4  ;;  %s1914_s12 = int_to_ptr.vmem [resolvable:$false] %s1913_s12 }
  0x48   : > { %s1915_s14 = scalar_lea.vmem %s1914_s12, 4096  ;;  %p1916_p5 = scmp.lt.s32.totalorder %s2222_s7, %s1914_s12 }
  0x49   : > { %p1911_p3 = pnand %p1909_p0, %p1865_p9  ;;  %p1917_p4 = scmp.lt.s32.totalorder %s1915_s14, %s1908_s17 }
  0x4b   : > { %p1912_p8 = pneg %p1911_p3  ;;  %p1918_p6 = por %p1917_p4, %p1916_p5 }
  0x4d   : > { %p1919_p11 = pnand %p1918_p6, %p1912_p8 }
  0x4f   : > { %1922 = shalt.err (!%p1919_p11)
}
  0x50   : > { %s2625_s11 = smov 8   ;;  %s2626_s15 = smov 128  }
  0x51   : > { %s2627_s6 = smov 256   ;;  %p2628_p9 = scmp.eq.s32.totalorder %s2188_s27, 0 }
  0x52   : > { %1692 = dma.hbm_to_vmem [thread:$0]  (!%p2141_p7), %s2185_s26, 2048, %s2222_s7, %s2147_s13, %s2627_s6, %s2626_s15, %s2625_s11  }
  0x53   : > { %p2629_p10 = pneg %p2214_p13  ;;  %s1923_s10 = scalar_lea.hbm %s2605_s0, 3072 }
  0x54   : > { %p1924_p5 = scmp.ne.s32.totalorder %s2605_s0, %s1923_s10  ;;  %p1930_p12 = scmp.lt.u32.totalorder %s1923_s10, %s2605_s0 }
  0x55   : > { %p2256_p1 = pnand %p2629_p10, %p2628_p9 }
  0x57   : > { %p1925_p8 = pneg %p2256_p1 }
  0x59   : > { %p1926_p2 = pnand %p1925_p8, %p1924_p5 }
  0x5b   : > { %p1927_p7 = pneg %p1926_p2 }
  0x5d   : > { %p1932_p0 = pnand %p1930_p12, %p1927_p7 }
  0x5f   : > { %1935 = shalt.err (!%p1932_p0)
}
  0x60   : > { %s1936_s7 = scalar_lea.vmem %s2218_s25, 3072  ;;  %p1944_p11 = scmp.lt.s32.totalorder %s2218_s25, %s2218_s25 }
  0x61   : > { %p1937_p3 = scmp.ne.s32.totalorder %s2218_s25, %s1936_s7  ;;  %p1945_p9 = scmp.lt.s32.totalorder %s1936_s7, %s1936_s7 }
  0x63   : > { %p1939_p4 = pnand %p1937_p3, %p1925_p8  ;;  %p1946_p10 = por %p1945_p9, %p1944_p11 }
  0x65   : > { %p1940_p6 = pneg %p1939_p4 }
  0x67   : > { %p1947_p13 = pnand %p1946_p10, %p1940_p6 }
  0x69   : > { %1950 = shalt.err (!%p1947_p13)
}
  0x6a   : > { %s2045_s1 = smov 192   ;;  %s2046_s11 = smov 12  }
  0x6b   : > { %1685 = dma.hbm_to_vmem [thread:$0]  (!%p2256_p1), %s2605_s0, 3072, %s2218_s25, [#allocation3], %s2045_s1, %s2045_s1, %s2046_s11  }
  0x6c   : > { %p2631_p5 = scmp.ne.s32.totalorder %s2624_s8, 0 }
  0x6d   : > { %p2632_p8 = scmp.eq.s32.totalorder (!%p2631_p5), %s2188_s27, 0 }
  0x6e   : > { %292 = sbr.rel (%p2631_p5) target bundleno = 487 (0x1e7), region = 40 }
  0x75   : > { %2004 = dma.done.wait (%p2632_p8), [#allocation3], 3072   ;;  %p2633_p2 = pmov %p2632_p8 }
  0x76   : > { %s298_s17 = sand.u32 1, %s2188_s27   ;;  %s2289_s12 = sand.u32 1, %s2021_s19  }
  0x77   : > { %2006 = vsyncadd (%p2633_p2), [#allocation3], 4294964224  ;;  %s1671_s16 = smul.u32 384, %s2289_s12  ;;  %s299_s10 = scalar_lea.sflag [#allocation6], %s298_s17 }
  0x78   : > { %p2634_p13 = scmp.ne.s32.totalorder %s2621_s28, 0 }
  0x79   : > { %s2292_s14 = scalar_lea.vmem [#allocation5], %s1671_s16 }
  0x7a   : > { %2008 = dma.done.wait (%p2634_p13), %s299_s10, 8192  }
  0x7b   : > { %2010 = vsyncadd (%p2634_p13), %s299_s10, 4294959104  ;;  %v2047_v0 = vmov 0   ;;  %v1759_v1 = vld [vmem:[%s2292_s14 + $0x4] ss:$8 sps:$4 sm:$0xff]   ;;  %v1761_v2 = vld [vmem:[%s2292_s14] ss:$8 sps:$4 sm:$0xff]  }
  0x7c   : > { %961 = vmatprep.mubr.bf16.mxu0 %v2047_v0  ;;  %816 = vmatprep.subr.bf16.mxu1 %v1759_v1  ;;  %v1762_v3 = vld [vmem:[%s2292_s14 + $0x14] ss:$8 sps:$4 sm:$0xff]   ;;  %v1764_v4 = vld [vmem:[%s2292_s14 + $0x10] ss:$8 sps:$4 sm:$0xff]   ;;  %v1765_v5 = vld [vmem:[%s2292_s14 + $0x24] ss:$8 sps:$4 sm:$0xff]  }
  0x7d   : > { %817 = vmatpush1.bf16.msra.mxu1 %v1761_v2  ;;  %v1767_v6 = vld [vmem:[%s2292_s14 + $0x20] ss:$8 sps:$4 sm:$0xff]   ;;  %v1768_v7 = vld [vmem:[%s2292_s14 + $0x34] ss:$8 sps:$4 sm:$0xff]   ;;  %v1770_v8 = vld [vmem:[%s2292_s14 + $0x30] ss:$8 sps:$4 sm:$0xff]  }
  0x7e   : > { %818 = vmatprep.subr.bf16.mxu1 %v1762_v3  ;;  %v1783_v9 = vld [vmem:[%s2292_s14 + $0x104] ss:$8 sps:$4 sm:$0xff]   ;;  %v1785_v10 = vld [vmem:[%s2292_s14 + $0x100] ss:$8 sps:$4 sm:$0xff]   ;;  %v1789_v12 = vld [vmem:[%s2292_s14 + $0x114] ss:$8 sps:$4 sm:$0xff]  }
  0x7f   : > { %v1771_v11 = vld [vmem:[%s2292_s14 + $0x44] ss:$8 sps:$4 sm:$0xff]   ;;  %929 = vmatprep.subr.bf16.mxu0 %v1783_v9  ;;  %v1791_v13 = vld [vmem:[%s2292_s14 + $0x110] ss:$8 sps:$4 sm:$0xff]   ;;  %v1773_v14 = vld [vmem:[%s2292_s14 + $0x40] ss:$8 sps:$4 sm:$0xff]  }
  0x80   : > { %930 = vmatpush1.bf16.msra.mxu0 %v1785_v10  ;;  %v1774_v15 = vld [vmem:[%s2292_s14 + $0x54] ss:$8 sps:$4 sm:$0xff]   ;;  %v1795_v16 = vld [vmem:[%s2292_s14 + $0x124] ss:$8 sps:$4 sm:$0xff]   ;;  %v1797_v17 = vld [vmem:[%s2292_s14 + $0x120] ss:$8 sps:$4 sm:$0xff]  }
  0x81   : > { %819 = vmatpush1.bf16.msra.mxu1 %v1764_v4  ;;  %931 = vmatprep.subr.bf16.mxu0 %v1789_v12  ;;  %v1776_v18 = vld [vmem:[%s2292_s14 + $0x50] ss:$8 sps:$4 sm:$0xff]   ;;  %v1801_v19 = vld [vmem:[%s2292_s14 + $0x134] ss:$8 sps:$4 sm:$0xff]   ;;  %v1777_v20 = vld [vmem:[%s2292_s14 + $0x64] ss:$8 sps:$4 sm:$0xff]  }
  0x82   : > { %820 = vmatprep.subr.bf16.mxu1 %v1765_v5  ;;  %v1803_v21 = vld [vmem:[%s2292_s14 + $0x130] ss:$8 sps:$4 sm:$0xff]   ;;  %v1779_v22 = vld [vmem:[%s2292_s14 + $0x60] ss:$8 sps:$4 sm:$0xff]   ;;  %v1807_v23 = vld [vmem:[%s2292_s14 + $0x144] ss:$8 sps:$4 sm:$0xff]  }
  0x83   : > { %v1780_v24 = vld [vmem:[%s2292_s14 + $0x74] ss:$8 sps:$4 sm:$0xff]   ;;  %v1809_v25 = vld [vmem:[%s2292_s14 + $0x140] ss:$8 sps:$4 sm:$0xff]   ;;  %v1782_v26 = vld [vmem:[%s2292_s14 + $0x70] ss:$8 sps:$4 sm:$0xff]  }
  0x84   : > { %932 = vmatpush1.bf16.msra.mxu0 %v1791_v13  ;;  %v1813_v27 = vld [vmem:[%s2292_s14 + $0x154] ss:$8 sps:$4 sm:$0xff]   ;;  %v1786_v28 = vld [vmem:[%s2292_s14 + $0x84] ss:$8 sps:$4 sm:$0xff]   ;;  %v1815_v29 = vld [vmem:[%s2292_s14 + $0x150] ss:$8 sps:$4 sm:$0xff]   ;;  %v1044_v13 = vlaneseq }
  0x85   : > { %821 = vmatpush1.bf16.msra.mxu1 %v1767_v6  ;;  %933 = vmatprep.subr.bf16.mxu0 %v1795_v16  ;;  %v1788_v30 = vld [vmem:[%s2292_s14 + $0x80] ss:$8 sps:$4 sm:$0xff]   ;;  %v1819_v31 = vld [vmem:[%s2292_s14 + $0x164] ss:$8 sps:$4 sm:$0xff]   ;;  %v1792_v32 = vld [vmem:[%s2292_s14 + $0x94] ss:$8 sps:$4 sm:$0xff]  }
  0x86   : > { %822 = vmatprep.subr.bf16.mxu1 %v1768_v7  ;;  %v1794_v33 = vld [vmem:[%s2292_s14 + $0x90] ss:$8 sps:$4 sm:$0xff]   ;;  %v1821_v34 = vld [vmem:[%s2292_s14 + $0x160] ss:$8 sps:$4 sm:$0xff]   ;;  %v1825_v36 = vld [vmem:[%s2292_s14 + $0x174] ss:$8 sps:$4 sm:$0xff]  }
  0x87   : > { %v1834_v35 = vld [vmem:[#allocation2 + $0x4] ss:$12 sps:$4 sm:$0xff]   ;;  %v1800_v39 = vld [vmem:[%s2292_s14 + $0xa0] ss:$8 sps:$4 sm:$0xff]   ;;  %v1804_v40 = vld [vmem:[%s2292_s14 + $0xb4] ss:$8 sps:$4 sm:$0xff]  }
  0x88   : > { %934 = vmatpush1.bf16.msra.mxu0 %v1797_v17  ;;  %v1798_v37 = vld [vmem:[%s2292_s14 + $0xa4] ss:$8 sps:$4 sm:$0xff]   ;;  %848 = vmatprep.mubr.bf16.mxu1 %v1834_v35  ;;  %v1827_v38 = vld [vmem:[%s2292_s14 + $0x170] ss:$8 sps:$4 sm:$0xff]   ;;  %v1831_v41 = vld [vmem:[#allocation2 + $0x8] ss:$12 sps:$4 sm:$0xff]  }
  0x89   : > { %823 = vmatpush1.bf16.msra.mxu1 %v1770_v8  ;;  %935 = vmatprep.subr.bf16.mxu0 %v1801_v19  ;;  %v1806_v42 = vld [vmem:[%s2292_s14 + $0xb0] ss:$8 sps:$4 sm:$0xff]   ;;  %v1810_v43 = vld [vmem:[%s2292_s14 + $0xc4] ss:$8 sps:$4 sm:$0xff]   ;;  %v1812_v44 = vld [vmem:[%s2292_s14 + $0xc0] ss:$8 sps:$4 sm:$0xff]  }
  0x8a   : > { %824 = vmatprep.subr.bf16.mxu1 %v1771_v11  ;;  %v1816_v45 = vld [vmem:[%s2292_s14 + $0xd4] ss:$8 sps:$4 sm:$0xff]   ;;  %v1835_v46 = vld [vmem:[#allocation2 + $0x20] ss:$12 sps:$4 sm:$0xff]   ;;  %v1818_v47 = vld [vmem:[%s2292_s14 + $0xd0] ss:$8 sps:$4 sm:$0xff]  }
  0x8b   : > { %v1822_v48 = vld [vmem:[%s2292_s14 + $0xe4] ss:$8 sps:$4 sm:$0xff]   ;;  %v1824_v49 = vld [vmem:[%s2292_s14 + $0xe0] ss:$8 sps:$4 sm:$0xff]   ;;  %v1828_v50 = vld [vmem:[%s2292_s14 + $0xf4] ss:$8 sps:$4 sm:$0xff]  }
  0x8c   : > { %936 = vmatpush1.bf16.msra.mxu0 %v1803_v21  ;;  %v1839_v51 = vld [vmem:[#allocation2 + $0x38] ss:$12 sps:$4 sm:$0xff]   ;;  %v1832_v53 = vld [vmem:[#allocation2] ss:$12 sps:$4 sm:$0xff]   ;;  %v1836_v54 = vld [vmem:[#allocation2 + $0x1c] ss:$12 sps:$4 sm:$0xff]  }
  0x8d   : > { %825 = vmatpush1.bf16.msra.mxu1 %v1773_v14  ;;  %937 = vmatprep.subr.bf16.mxu0 %v1807_v23  ;;  %v1830_v52 = vld [vmem:[%s2292_s14 + $0xf0] ss:$8 sps:$4 sm:$0xff]   ;;  %v1840_v57 = vld [vmem:[#allocation2 + $0x34] ss:$12 sps:$4 sm:$0xff]   ;;  %v1852_v3 = vld [vmem:[#allocation2 + $0x7c] ss:$12 sps:$4 sm:$0xff]  }
  0x8e   : > { %826 = vmatprep.subr.bf16.mxu1 %v1774_v15  ;;  %v1843_v55 = vld [vmem:[#allocation2 + $0x50] ss:$12 sps:$4 sm:$0xff]   ;;  %v1838_v56 = vld [vmem:[#allocation2 + $0x18] ss:$12 sps:$4 sm:$0xff]   ;;  %v1847_v58 = vld [vmem:[#allocation2 + $0x68] ss:$12 sps:$4 sm:$0xff]  }
  0x8f   : > { %v1842_v59 = vld [vmem:[#allocation2 + $0x30] ss:$12 sps:$4 sm:$0xff]   ;;  %v1844_v60 = vld [vmem:[#allocation2 + $0x4c] ss:$12 sps:$4 sm:$0xff]   ;;  %v1846_v62 = vld [vmem:[#allocation2 + $0x48] ss:$12 sps:$4 sm:$0xff]  }
  0x90   : > { %938 = vmatpush1.bf16.msra.mxu0 %v1809_v25  ;;  %v1851_v61 = vld [vmem:[#allocation2 + $0x80] ss:$12 sps:$4 sm:$0xff]   ;;  %v1848_v63 = vld [vmem:[#allocation2 + $0x64] ss:$12 sps:$4 sm:$0xff]   ;;  %v1862_v9 = vld [vmem:[#allocation2 + $0xa8] ss:$12 sps:$4 sm:$0xff]  }
  0x91   : > { %827 = vmatpush1.bf16.msra.mxu1 %v1776_v18  ;;  %939 = vmatprep.subr.bf16.mxu0 %v1813_v27  ;;  %v1855_v1 = vld [vmem:[#allocation2 + $0x98] ss:$12 sps:$4 sm:$0xff]   ;;  %v1850_v2 = vld [vmem:[#allocation2 + $0x60] ss:$12 sps:$4 sm:$0xff]   ;;  %v1859_v4 = vld [vmem:[#allocation2 + $0xb0] ss:$12 sps:$4 sm:$0xff]  }
  0x92   : > { %828 = vmatprep.subr.bf16.mxu1 %v1777_v20  ;;  %v1854_v5 = vld [vmem:[#allocation2 + $0x78] ss:$12 sps:$4 sm:$0xff]   ;;  %v1856_v6 = vld [vmem:[#allocation2 + $0x94] ss:$12 sps:$4 sm:$0xff]   ;;  %v1858_v7 = vld [vmem:[#allocation2 + $0x90] ss:$12 sps:$4 sm:$0xff]  }
  0x93   : > { %v1860_v8 = vld [vmem:[#allocation2 + $0xac] ss:$12 sps:$4 sm:$0xff]   ;;  %s1524_s27 = sshll.u32 %s2029_s21, 1  ;;  %v1045_v18 = vshrl.u32 %v1044_v13, 7  ;;  %s1522_s1 = sshll.u32 %s2289_s12, 7 }
  0x94   : > { %940 = vmatpush1.bf16.msra.mxu0 %v1815_v29  ;;  %p354_p1 = scmp.lt.s32.totalorder %s1524_s27, 3  ;;  %s2380_s11 = scalar_lea.vmem [#allocation7], %s1522_s1 }
  0x95   : > { %829 = vmatpush1.bf16.msra.mxu1 %v1779_v22  ;;  %941 = vmatprep.subr.bf16.mxu0 %v1819_v31  ;;  %v1046_v19 = vsub.s32 0, %v1045_v18  ;;  %v1050_v22 = vsub.s32 1, %v1045_v18  ;;  %v1165_v13 = vld [vmem:[%s2380_s11 + $0x18] sm:$0xff]  ;;  %s2417_s15 = scalar_lea.vmem [#allocation8], %s1522_s1  ;;  %s1637_s6 = sshll.u32 %s2029_s21, 7 }
  0x96   : > { %830 = vmatprep.subr.bf16.mxu1 %v1780_v24  ;;  %s2646_s27 = smov (!%p354_p1, %s1524_s27), 3  ;;  %s1371_s17 = sshll.u32 %s2417_s15, 4  ;;  %s2554_s17 = int_to_ptr.vmem [resolvable:$true] %s1371_s17 }
  0x97   : > { %s356_s25 = scalar_lea.vmem %s2607_s2, %s2646_s27  ;;  %s361_s7 = scalar_lea.vmem %s2608_s3, %s2646_s27 }
  0x98   : > { %942 = vmatpush1.bf16.msra.mxu0 %v1821_v34  ;;  %v1042_v21 = vld [vmem:[%s356_s25] sm:$0x3]  ;;  %s2552_s14 = scalar_lea.hbm %s2610_s5, %s1637_s6  ;;  %s1355_s21 = scalar_lea.sflag [#allocation4], %s2289_s12 }
  0x99   : > { %831 = vmatpush1.bf16.msra.mxu1 %v1782_v26  ;;  %943 = vmatprep.subr.bf16.mxu0 %v1825_v36  ;;  %v1086_v25 = vld [vmem:[%s361_s7] sm:$0x3]  ;;  %v2372_v27 = vrot.slane %v1042_v21, %v1046_v19  ;;  %v2374_v29 = vrot.slane %v1042_v21, %v1050_v22  ;;  %s1951_s27 = scalar_lea.vmem %s2554_s17, 2048  ;;  %p2635_p12 = scmp.ne.s32.totalorder %s2622_s29, 0 }
  0x9a   : > { %832 = vmatprep.subr.bf16.mxu1 %v1786_v28  ;;  %v2376_v31 = vrot.slane %v1086_v25, %v1046_v19  ;;  %v2383_v35 = vrot.slane %v1086_v25, %v1050_v22  ;;  %p1952_p7 = scmp.ne.s32.totalorder %s2554_s17, %s1951_s27  ;;  %s2048_s28 = smov [#allocation8]  }
  0x9b   : > { %s1955_s8 = sshll.u32 %s2048_s28, 4  ;;  %s1956_s8 = int_to_ptr.vmem [resolvable:$false] %s1955_s8 }
  0x9c   : > { %944 = vmatpush1.bf16.msra.mxu0 %v1827_v38  ;;  %p1953_p0 = pnand %p1952_p7, %p2635_p12  ;;  %s1957_s25 = scalar_lea.vmem %s1956_s8, 4096 }
  0x9d   : > { %833 = vmatpush1.bf16.msra.mxu1 %v1788_v30  ;;  %p1958_p4 = scmp.lt.s32.totalorder %s2554_s17, %s1956_s8  ;;  %p1959_p6 = scmp.lt.s32.totalorder %s1957_s25, %s1951_s27 }
  0x9e   : > { %834 = vmatprep.subr.bf16.mxu1 %v1792_v32  ;;  %p1954_p3 = pneg %p1953_p0 }
  0x9f   : > { %962 = vmatmul.mubr.bf16.vlgmr.msra.gmra.mrb[0].mxu0 %v1831_v41  ;;  %p1960_p11 = por %p1959_p6, %p1958_p4 }
  0xa0   : > { %971 = vmatprep.mubr.bf16.mxu0 %v2047_v0 }
  0xa1   : > { %835 = vmatpush1.bf16.msra.mxu1 %v1794_v33  ;;  %v1162_v33 = vld [vmem:[%s2380_s11] sm:$0xff]  ;;  %p1961_p9 = pnand %p1960_p11, %p1954_p3 }
  0xa2   : > { %836 = vmatprep.subr.bf16.mxu1 %v1798_v37 }
  0xa5   : > { %837 = vmatpush1.bf16.msra.mxu1 %v1800_v39 }
  0xa6   : > { %838 = vmatprep.subr.bf16.mxu1 %v1804_v40 }
  0xa7   : > { %972 = vmatmul.mubr.bf16.gmra.mrb[4].mxu0 %v1835_v46  ;;  %v1178_v46 = vunpack.c.l.bf16 %v1162_v33 }
  0xa8   : > { %981 = vmatprep.mubr.bf16.mxu0 %v2047_v0 }
  0xa9   : > { %839 = vmatpush1.bf16.msra.mxu1 %v1806_v42  ;;  %v1163_v42 = vld [vmem:[%s2380_s11 + $0x8] sm:$0xff] }
  0xaa   : > { %840 = vmatprep.subr.bf16.mxu1 %v1810_v43 }
  0xad   : > { %841 = vmatpush1.bf16.msra.mxu1 %v1812_v44 }
  0xae   : > { %842 = vmatprep.subr.bf16.mxu1 %v1816_v45 }
  0xaf   : > { %982 = vmatmul.mubr.bf16.gmra.mrb[8].mxu0 %v1839_v51 }
  0xb0   : > { %991 = vmatprep.mubr.bf16.mxu0 %v2047_v0 }
  0xb1   : > { %843 = vmatpush1.bf16.msra.mxu1 %v1818_v47 }
  0xb2   : > { %844 = vmatprep.subr.bf16.mxu1 %v1822_v48 }
  0xb5   : > { %845 = vmatpush1.bf16.msra.mxu1 %v1824_v49 }
  0xb6   : > { %846 = vmatprep.subr.bf16.mxu1 %v1828_v50  ;;  %v1179_v50 = vunpack.c.h.bf16 %v1162_v33 }
  0xb7   : > { %992 = vmatmul.mubr.bf16.gmra.mrb[12].mxu0 %v1843_v55  ;;  %v1180_v55 = vunpack.c.l.bf16 %v1163_v42 }
  0xb8   : > { %1001 = vmatprep.mubr.bf16.mxu0 %v2047_v0 }
  0xb9   : > { %847 = vmatpush1.bf16.msra.mxu1 %v1830_v52 }
  0xbc   : > { %849 = vmatmul.mubr.bf16.vlgmr.msra.gmra.mrb[0].mxu1 %v1832_v53 }
  0xbd   : > { %858 = vmatprep.mubr.bf16.mxu1 %v1836_v54 }
  0xbf   : > { %1002 = vmatmul.mubr.bf16.gmra.mrb[16].mxu0 %v1847_v58  ;;  %v1181_v58 = vunpack.c.h.bf16 %v1163_v42 }
  0xc0   : > { %1011 = vmatprep.mubr.bf16.mxu0 %v2047_v0 }
  0xc4   : > { %859 = vmatmul.mubr.bf16.gmra.mrb[4].mxu1 %v1838_v56 }
  0xc5   : > { %868 = vmatprep.mubr.bf16.mxu1 %v1840_v57 }
  0xc7   : > { %1012 = vmatmul.mubr.bf16.gmra.mrb[20].mxu0 %v1851_v61 }
  0xc8   : > { %1021 = vmatprep.mubr.bf16.mxu0 %v2047_v0 }
  0xcc   : > { %869 = vmatmul.mubr.bf16.gmra.mrb[8].mxu1 %v1842_v59 }
  0xcd   : > { %878 = vmatprep.mubr.bf16.mxu1 %v1844_v60 }
  0xcf   : > { %1022 = vmatmul.mubr.bf16.gmra.mrb[24].mxu0 %v1855_v1 }
  0xd0   : > { %1031 = vmatprep.mubr.bf16.mxu0 %v2047_v0 }
  0xd4   : > { %879 = vmatmul.mubr.bf16.gmra.mrb[12].mxu1 %v1846_v62 }
  0xd5   : > { %888 = vmatprep.mubr.bf16.mxu1 %v1848_v63 }
  0xd7   : > { %1032 = vmatmul.mubr.bf16.gmra.mrb[28].mxu0 %v1859_v4 }
  0xdc   : > { %889 = vmatmul.mubr.bf16.gmra.mrb[16].mxu1 %v1850_v2 }
  0xdd   : > { %898 = vmatprep.mubr.bf16.mxu1 %v1852_v3  ;;  %v1164_v3 = vld [vmem:[%s2380_s11 + $0x10] sm:$0xff] }
  0xde   : > { %v1182_v19 = vunpack.c.l.bf16 %v1164_v3 }
  0xe4   : > { %899 = vmatmul.mubr.bf16.gmra.mrb[20].mxu1 %v1854_v5 }
  0xe5   : > { %908 = vmatprep.mubr.bf16.mxu1 %v1856_v6 }
  0xec   : > { %909 = vmatmul.mubr.bf16.gmra.mrb[24].mxu1 %v1858_v7 }
  0xed   : > { %918 = vmatprep.mubr.bf16.mxu1 %v1860_v8 }
  0xf4   : > { %919 = vmatmul.mubr.bf16.gmra.mrb[28].mxu1 %v1862_v9 }
 0x172   : > { %v963_v10 = vpop.f32.mrb[0].mxu0 }
 0x173   : > { %v965_v11 = vpop.f32.mrb[1].mxu0 }
 0x174   : > { %v967_v0 = vpop.f32.mrb[2].mxu0 }
 0x175   : > { %v969_v12 = vpop.f32.mrb[3].mxu0 }
 0x17a   : > { %v973_v14 = vpop.f32.mrb[4].mxu0 }
 0x17b   : > { %v975_v15 = vpop.f32.mrb[5].mxu0 }
 0x17c   : > { %v977_v16 = vpop.f32.mrb[6].mxu0 }
 0x17d   : > { %v2355_v17 = vpop.f32.mrb[7].mxu0 }
 0x182   : > { %v2363_v20 = vpop.f32.mrb[8].mxu0 }
 0x183   : > { %v2366_v23 = vpop.f32.mrb[9].mxu0 }
 0x184   : > { %v2368_v24 = vpop.f32.mrb[10].mxu0 }
 0x185   : > { %v2370_v26 = vpop.f32.mrb[11].mxu0 }
 0x18a   : > { %v2386_v40 = vpop.f32.mrb[12].mxu0 }
 0x18b   : > { %v2390_v44 = vpop.f32.mrb[13].mxu0 }
 0x18c   : > { %v2394_v48 = vpop.f32.mrb[14].mxu0 }
 0x18d   : > { %v2398_v52 = vpop.f32.mrb[15].mxu0 }
 0x18f   : > { %v850_v28 = vpop.f32.mrb[0].mxu1 }
 0x190   : > { %v964_v30 = vadd.f32 %v963_v10, %v850_v28  ;;  %v852_v32 = vpop.f32.mrb[1].mxu1  ;;  %v1183_v28 = vunpack.c.h.bf16 %v1164_v3 }
 0x191   : > { %v966_v34 = vadd.f32 %v965_v11, %v852_v32  ;;  %v854_v36 = vpop.f32.mrb[2].mxu1 }
 0x192   : > { %v1054_v37 = vmul.f32 %v2372_v27, %v964_v30  ;;  %v968_v38 = vadd.f32 %v967_v0, %v854_v36  ;;  %v856_v39 = vpop.f32.mrb[3].mxu1  ;;  %v2404_v10 = vpop.f32.mrb[16].mxu0 }
 0x193   : > { %v1055_v41 = vmul.f32 %v2374_v29, %v966_v34  ;;  %v970_v43 = vadd.f32 %v969_v12, %v856_v39  ;;  %v2409_v18 = vpop.f32.mrb[17].mxu0  ;;  %v1184_v34 = vunpack.c.l.bf16 %v1165_v13 }
 0x194   : > { %v1098_v45 = vadd.f32 %v2376_v31, %v1054_v37  ;;  %v1056_v47 = vmul.f32 %v2372_v27, %v968_v38  ;;  %v2413_v22 = vpop.f32.mrb[18].mxu0  ;;  %v1185_v38 = vunpack.c.h.bf16 %v1165_v13 }
 0x195   : > { %v1099_v49 = vadd.f32 %v2383_v35, %v1055_v41  ;;  %v1057_v51 = vmul.f32 %v2374_v29, %v970_v43  ;;  %v2422_v30 = vpop.f32.mrb[19].mxu0 }
 0x196   : > { %v1130_v53 = vmax.f32 %v1098_v45, 0.0  ;;  %v1100_v54 = vadd.f32 %v2376_v31, %v1056_v47 }
 0x197   : > { %v1131_v56 = vmax.f32 %v1099_v49, 0.0  ;;  %v1101_v57 = vadd.f32 %v2383_v35, %v1057_v51  ;;  %v860_v59 = vpop.f32.mrb[4].mxu1  ;;  %v1166_v49 = vld [vmem:[%s2380_s11 + $0x20] sm:$0xff] }
 0x198   : > { %v1210_v60 = vadd.f32 %v1178_v46, %v1130_v53  ;;  %v1132_v61 = vmax.f32 %v1100_v54, 0.0  ;;  %v974_v62 = vadd.f32 %v973_v14, %v860_v59  ;;  %v862_v63 = vpop.f32.mrb[5].mxu1 }
 0x199   : > { %v1211_v1 = vadd.f32 %v1179_v50, %v1131_v56  ;;  %v1133_v2 = vmax.f32 %v1101_v57, 0.0  ;;  %v976_v4 = vadd.f32 %v975_v15, %v862_v63  ;;  %v864_v5 = vpop.f32.mrb[6].mxu1  ;;  %v1186_v63 = vunpack.c.l.bf16 %v1166_v49 }
 0x19a   : > { %v1212_v6 = vadd.f32 %v1180_v55, %v1132_v61  ;;  %v1058_v7 = vmul.f32 %v2372_v27, %v974_v62  ;;  %v978_v8 = vadd.f32 %v977_v16, %v864_v5  ;;  %v866_v9 = vpop.f32.mrb[7].mxu1  ;;  %v2432_v57 = vpop.f32.mrb[20].mxu0 }
 0x19b   : > { %v1621_v11 = vpack.c.bf16 %v1211_v1, %v1210_v60  ;;  %v1213_v0 = vadd.f32 %v1181_v58, %v1133_v2  ;;  %v1059_v12 = vmul.f32 %v2374_v29, %v976_v4  ;;  %v980_v14 = vadd.f32 %v2355_v17, %v866_v9  ;;  %v1167_v60 = vld [vmem:[%s2380_s11 + $0x28] sm:$0xff]  ;;  %v2437_v62 = vpop.f32.mrb[21].mxu0 }
 0x19c   : > { %v1102_v15 = vadd.f32 %v2376_v31, %v1058_v7  ;;  %v1060_v21 = vmul.f32 %v2372_v27, %v978_v8  ;;  %v2441_v2 = vpop.f32.mrb[22].mxu0  ;;  %v1187_v4 = vunpack.c.h.bf16 %v1166_v49  ;;  %v1188_v8 = vunpack.c.l.bf16 %v1167_v60 }
 0x19d   : > { %1338 = vst [vmem:[%s2417_s15] sm:$0xff] %v1621_v11  ;;  %v1622_v16 = vpack.c.bf16 %v1213_v0, %v1212_v6  ;;  %v1103_v25 = vadd.f32 %v2383_v35, %v1059_v12  ;;  %v1061_v17 = vmul.f32 %v2374_v29, %v980_v14  ;;  %v2446_v6 = vpop.f32.mrb[23].mxu0  ;;  %v1189_v0 = vunpack.c.h.bf16 %v1167_v60 }
 0x19e   : > { %v1134_v32 = vmax.f32 %v1102_v15, 0.0  ;;  %v1104_v33 = vadd.f32 %v2376_v31, %v1060_v21 }
 0x19f   : > { %1339 = vst [vmem:[%s2417_s15 + $0x8] sm:$0xff] %v1622_v16  ;;  %v1135_v36 = vmax.f32 %v1103_v25, 0.0  ;;  %v1105_v37 = vadd.f32 %v2383_v35, %v1061_v17  ;;  %v870_v39 = vpop.f32.mrb[8].mxu1  ;;  %v1168_v25 = vld [vmem:[%s2380_s11 + $0x30] sm:$0xff] }
 0x1a0   : > { %v1214_v41 = vadd.f32 %v1182_v19, %v1134_v32  ;;  %v1136_v42 = vmax.f32 %v1104_v33, 0.0  ;;  %v984_v43 = vadd.f32 %v2363_v20, %v870_v39  ;;  %v872_v45 = vpop.f32.mrb[9].mxu1 }
 0x1a1   : > { %v1215_v46 = vadd.f32 %v1183_v28, %v1135_v36  ;;  %v1137_v47 = vmax.f32 %v1105_v37, 0.0  ;;  %v986_v50 = vadd.f32 %v2366_v23, %v872_v45  ;;  %v874_v51 = vpop.f32.mrb[10].mxu1  ;;  %v1190_v45 = vunpack.c.l.bf16 %v1168_v25 }
 0x1a2   : > { %v1216_v53 = vadd.f32 %v1184_v34, %v1136_v42  ;;  %v1062_v54 = vmul.f32 %v2372_v27, %v984_v43  ;;  %v988_v55 = vadd.f32 %v2368_v24, %v874_v51  ;;  %v876_v56 = vpop.f32.mrb[11].mxu1  ;;  %v2456_v37 = vpop.f32.mrb[24].mxu0 }
 0x1a3   : > { %v1623_v58 = vpack.c.bf16 %v1215_v46, %v1214_v41  ;;  %v1217_v59 = vadd.f32 %v1185_v38, %v1137_v47  ;;  %v1063_v20 = vmul.f32 %v2374_v29, %v986_v50  ;;  %v990_v61 = vadd.f32 %v2370_v26, %v876_v56  ;;  %v1169_v41 = vld [vmem:[%s2380_s11 + $0x38] sm:$0xff]  ;;  %v2461_v43 = vpop.f32.mrb[25].mxu0 }
 0x1a4   : > { %v1106_v23 = vadd.f32 %v2376_v31, %v1062_v54  ;;  %v1064_v1 = vmul.f32 %v2372_v27, %v988_v55  ;;  %v2465_v47 = vpop.f32.mrb[26].mxu0  ;;  %v1191_v50 = vunpack.c.h.bf16 %v1168_v25  ;;  %v1192_v55 = vunpack.c.l.bf16 %v1169_v41 }
 0x1a5   : > { %1340 = vst [vmem:[%s2417_s15 + $0x10] sm:$0xff] %v1623_v58  ;;  %v1624_v24 = vpack.c.bf16 %v1217_v59, %v1216_v53  ;;  %v1107_v3 = vadd.f32 %v2383_v35, %v1063_v20  ;;  %v1065_v5 = vmul.f32 %v2374_v29, %v990_v61  ;;  %v2470_v53 = vpop.f32.mrb[27].mxu0  ;;  %v1193_v59 = vunpack.c.h.bf16 %v1169_v41 }
 0x1a6   : > { %v1138_v26 = vmax.f32 %v1106_v23, 0.0  ;;  %v1108_v7 = vadd.f32 %v2376_v31, %v1064_v1 }
 0x1a7   : > { %1341 = vst [vmem:[%s2417_s15 + $0x18] sm:$0xff] %v1624_v24  ;;  %v1139_v9 = vmax.f32 %v1107_v3, 0.0  ;;  %v1109_v11 = vadd.f32 %v2383_v35, %v1065_v5  ;;  %v880_v12 = vpop.f32.mrb[12].mxu1  ;;  %v1170_v3 = vld [vmem:[%s2380_s11 + $0x40] sm:$0xff] }
 0x1a8   : > { %v1218_v13 = vadd.f32 %v1186_v63, %v1138_v26  ;;  %v1140_v14 = vmax.f32 %v1108_v7, 0.0  ;;  %v994_v15 = vadd.f32 %v2386_v40, %v880_v12  ;;  %v882_v19 = vpop.f32.mrb[13].mxu1 }
 0x1a9   : > { %v1219_v21 = vadd.f32 %v1187_v4, %v1139_v9  ;;  %v1141_v16 = vmax.f32 %v1109_v11, 0.0  ;;  %v996_v28 = vadd.f32 %v2390_v44, %v882_v19  ;;  %v884_v17 = vpop.f32.mrb[14].mxu1  ;;  %v1194_v19 = vunpack.c.l.bf16 %v1170_v3 }
 0x1aa   : > { %v1220_v32 = vadd.f32 %v1188_v8, %v1140_v14  ;;  %v1066_v33 = vmul.f32 %v2372_v27, %v994_v15  ;;  %v998_v34 = vadd.f32 %v2394_v48, %v884_v17  ;;  %v886_v36 = vpop.f32.mrb[15].mxu1  ;;  %v2480_v11 = vpop.f32.mrb[28].mxu0 }
 0x1ab   : > { %v1625_v38 = vpack.c.bf16 %v1219_v21, %v1218_v13  ;;  %v1221_v39 = vadd.f32 %v1189_v0, %v1141_v16  ;;  %v1067_v40 = vmul.f32 %v2374_v29, %v996_v28  ;;  %v1000_v42 = vadd.f32 %v2398_v52, %v886_v36  ;;  %v1171_v13 = vld [vmem:[%s2380_s11 + $0x48] sm:$0xff]  ;;  %v2485_v15 = vpop.f32.mrb[29].mxu0 }
 0x1ac   : > { %v1110_v44 = vadd.f32 %v2376_v31, %v1066_v33  ;;  %v1068_v46 = vmul.f32 %v2372_v27, %v998_v34  ;;  %v2489_v16 = vpop.f32.mrb[30].mxu0  ;;  %v1195_v28 = vunpack.c.h.bf16 %v1170_v3  ;;  %v1196_v34 = vunpack.c.l.bf16 %v1171_v13 }
 0x1ad   : > { %1342 = vst [vmem:[%s2417_s15 + $0x20] sm:$0xff] %v1625_v38  ;;  %v1626_v48 = vpack.c.bf16 %v1221_v39, %v1220_v32  ;;  %v1111_v49 = vadd.f32 %v2383_v35, %v1067_v40  ;;  %v1069_v51 = vmul.f32 %v2374_v29, %v1000_v42  ;;  %v2494_v32 = vpop.f32.mrb[31].mxu0  ;;  %v1197_v39 = vunpack.c.h.bf16 %v1171_v13 }
 0x1ae   : > { %v1142_v52 = vmax.f32 %v1110_v44, 0.0  ;;  %v1112_v54 = vadd.f32 %v2376_v31, %v1068_v46 }
 0x1af   : > { %1343 = vst [vmem:[%s2417_s15 + $0x28] sm:$0xff] %v1626_v48  ;;  %v1143_v56 = vmax.f32 %v1111_v49, 0.0  ;;  %v1113_v58 = vadd.f32 %v2383_v35, %v1069_v51  ;;  %v890_v20 = vpop.f32.mrb[16].mxu1  ;;  %v1172_v49 = vld [vmem:[%s2380_s11 + $0x50] sm:$0xff] }
 0x1b0   : > { %v1222_v60 = vadd.f32 %v1190_v45, %v1142_v52  ;;  %v1144_v61 = vmax.f32 %v1112_v54, 0.0  ;;  %v1004_v23 = vadd.f32 %v2404_v10, %v890_v20  ;;  %v892_v63 = vpop.f32.mrb[17].mxu1 }
 0x1b1   : > { %v1223_v1 = vadd.f32 %v1191_v50, %v1143_v56  ;;  %v1145_v24 = vmax.f32 %v1113_v58, 0.0  ;;  %v1006_v4 = vadd.f32 %v2409_v18, %v892_v63  ;;  %v894_v5 = vpop.f32.mrb[18].mxu1 }
 0x1b2   : > { %v1224_v26 = vadd.f32 %v1192_v55, %v1144_v61  ;;  %v1070_v7 = vmul.f32 %v2372_v27, %v1004_v23  ;;  %v1008_v8 = vadd.f32 %v2413_v22, %v894_v5  ;;  %v896_v9 = vpop.f32.mrb[19].mxu1  ;;  %v1198_v23 = vunpack.c.l.bf16 %v1172_v49 }
 0x1b3   : > { %v1627_v0 = vpack.c.bf16 %v1223_v1, %v1222_v60  ;;  %v1225_v12 = vadd.f32 %v1193_v59, %v1145_v24  ;;  %v1071_v10 = vmul.f32 %v2374_v29, %v1006_v4  ;;  %v1010_v14 = vadd.f32 %v2422_v30, %v896_v9 }
 0x1b4   : > { %v1114_v18 = vadd.f32 %v2376_v31, %v1070_v7  ;;  %v1072_v21 = vmul.f32 %v2372_v27, %v1008_v8  ;;  %v1199_v24 = vunpack.c.h.bf16 %v1172_v49 }
 0x1b5   : > { %1344 = vst [vmem:[%s2417_s15 + $0x30] sm:$0xff] %v1627_v0  ;;  %v1628_v22 = vpack.c.bf16 %v1225_v12, %v1224_v26  ;;  %v1115_v25 = vadd.f32 %v2383_v35, %v1071_v10  ;;  %v1073_v17 = vmul.f32 %v2374_v29, %v1010_v14 }
 0x1b6   : > { %v1146_v30 = vmax.f32 %v1114_v18, 0.0  ;;  %v1116_v33 = vadd.f32 %v2376_v31, %v1072_v21  ;;  %v1174_v18 = vld [vmem:[%s2380_s11 + $0x60] sm:$0xff] }
 0x1b7   : > { %1345 = vst [vmem:[%s2417_s15 + $0x38] sm:$0xff] %v1628_v22  ;;  %v1147_v36 = vmax.f32 %v1115_v25, 0.0  ;;  %v1117_v38 = vadd.f32 %v2383_v35, %v1073_v17  ;;  %v900_v40 = vpop.f32.mrb[20].mxu1 }
 0x1b8   : > { %v1226_v41 = vadd.f32 %v1194_v19, %v1146_v30  ;;  %v1148_v42 = vmax.f32 %v1116_v33, 0.0  ;;  %v1014_v44 = vadd.f32 %v2432_v57, %v900_v40  ;;  %v902_v45 = vpop.f32.mrb[21].mxu1  ;;  %v1173_v57 = vld [vmem:[%s2380_s11 + $0x58] sm:$0xff] }
 0x1b9   : > { %v1227_v46 = vadd.f32 %v1195_v28, %v1147_v36  ;;  %v1149_v48 = vmax.f32 %v1117_v38, 0.0  ;;  %v1016_v50 = vadd.f32 %v2437_v62, %v902_v45  ;;  %v904_v51 = vpop.f32.mrb[22].mxu1  ;;  %v1200_v5 = vunpack.c.l.bf16 %v1173_v57 }
 0x1ba   : > { %v1228_v52 = vadd.f32 %v1196_v34, %v1148_v42  ;;  %v1074_v54 = vmul.f32 %v2372_v27, %v1014_v44  ;;  %v1018_v55 = vadd.f32 %v2441_v2, %v904_v51  ;;  %v906_v56 = vpop.f32.mrb[23].mxu1  ;;  %v1201_v7 = vunpack.c.h.bf16 %v1173_v57 }
 0x1bb   : > { %v1629_v58 = vpack.c.bf16 %v1227_v46, %v1226_v41  ;;  %v1229_v59 = vadd.f32 %v1197_v39, %v1149_v48  ;;  %v1075_v20 = vmul.f32 %v2374_v29, %v1016_v50  ;;  %v1020_v60 = vadd.f32 %v2446_v6, %v906_v56 }
 0x1bc   : > { %v1118_v61 = vadd.f32 %v2376_v31, %v1074_v54  ;;  %v1076_v62 = vmul.f32 %v2372_v27, %v1018_v55  ;;  %v1202_v39 = vunpack.c.l.bf16 %v1174_v18  ;;  %v1203_v42 = vunpack.c.h.bf16 %v1174_v18 }
 0x1bd   : > { %1346 = vst [vmem:[%s2417_s15 + $0x40] sm:$0xff] %v1629_v58  ;;  %v1630_v63 = vpack.c.bf16 %v1229_v59, %v1228_v52  ;;  %v1119_v1 = vadd.f32 %v2383_v35, %v1075_v20  ;;  %v1077_v2 = vmul.f32 %v2374_v29, %v1020_v60  ;;  %v1176_v59 = vld [vmem:[%s2380_s11 + $0x70] sm:$0xff] }
 0x1be   : > { %v1150_v3 = vmax.f32 %v1118_v61, 0.0  ;;  %v1120_v4 = vadd.f32 %v2376_v31, %v1076_v62 }
 0x1bf   : > { %1347 = vst [vmem:[%s2417_s15 + $0x48] sm:$0xff] %v1630_v63  ;;  %v1151_v26 = vmax.f32 %v1119_v1, 0.0  ;;  %v1121_v6 = vadd.f32 %v2383_v35, %v1077_v2  ;;  %v910_v8 = vpop.f32.mrb[24].mxu1 }
 0x1c0   : > { %v1230_v9 = vadd.f32 %v1198_v23, %v1150_v3  ;;  %v1152_v0 = vmax.f32 %v1120_v4, 0.0  ;;  %v1024_v12 = vadd.f32 %v2456_v37, %v910_v8  ;;  %v912_v10 = vpop.f32.mrb[25].mxu1  ;;  %v1175_v37 = vld [vmem:[%s2380_s11 + $0x68] sm:$0xff]  ;;  %v1206_v4 = vunpack.c.l.bf16 %v1176_v59 }
 0x1c1   : > { %v1231_v13 = vadd.f32 %v1199_v24, %v1151_v26  ;;  %v1153_v14 = vmax.f32 %v1121_v6, 0.0  ;;  %v1026_v19 = vadd.f32 %v2461_v43, %v912_v10  ;;  %v914_v21 = vpop.f32.mrb[26].mxu1  ;;  %v1204_v46 = vunpack.c.l.bf16 %v1175_v37 }
 0x1c2   : > { %v1232_v22 = vadd.f32 %v1200_v5, %v1152_v0  ;;  %v1078_v25 = vmul.f32 %v2372_v27, %v1024_v12  ;;  %v1028_v28 = vadd.f32 %v2465_v47, %v914_v21  ;;  %v916_v17 = vpop.f32.mrb[27].mxu1  ;;  %v1205_v49 = vunpack.c.h.bf16 %v1175_v37 }
 0x1c3   : > { %v1631_v30 = vpack.c.bf16 %v1231_v13, %v1230_v9  ;;  %v1233_v33 = vadd.f32 %v1201_v7, %v1153_v14  ;;  %v1079_v34 = vmul.f32 %v2374_v29, %v1026_v19  ;;  %v1030_v36 = vadd.f32 %v2470_v53, %v916_v17 }
 0x1c4   : > { %v1122_v38 = vadd.f32 %v2376_v31, %v1078_v25  ;;  %v1080_v43 = vmul.f32 %v2372_v27, %v1028_v28  ;;  %v1207_v26 = vunpack.c.h.bf16 %v1176_v59 }
 0x1c5   : > { %1348 = vst [vmem:[%s2417_s15 + $0x50] sm:$0xff] %v1631_v30  ;;  %v1632_v40 = vpack.c.bf16 %v1233_v33, %v1232_v22  ;;  %v1123_v41 = vadd.f32 %v2383_v35, %v1079_v34  ;;  %v1081_v47 = vmul.f32 %v2374_v29, %v1030_v36 }
 0x1c6   : > { %v1154_v44 = vmax.f32 %v1122_v38, 0.0  ;;  %v1124_v45 = vadd.f32 %v2376_v31, %v1080_v43 }
 0x1c7   : > { %1349 = vst [vmem:[%s2417_s15 + $0x58] sm:$0xff] %v1632_v40  ;;  %v1155_v48 = vmax.f32 %v1123_v41, 0.0  ;;  %v1125_v53 = vadd.f32 %v2383_v35, %v1081_v47  ;;  %v920_v50 = vpop.f32.mrb[28].mxu1 }
 0x1c8   : > { %v1234_v51 = vadd.f32 %v1202_v39, %v1154_v44  ;;  %v1156_v52 = vmax.f32 %v1124_v45, 0.0  ;;  %v1034_v54 = vadd.f32 %v2480_v11, %v920_v50  ;;  %v922_v55 = vpop.f32.mrb[29].mxu1  ;;  %v1177_v11 = vld [vmem:[%s2380_s11 + $0x78] sm:$0xff] }
 0x1c9   : > { %v1235_v56 = vadd.f32 %v1203_v42, %v1155_v48  ;;  %v1157_v58 = vmax.f32 %v1125_v53, 0.0  ;;  %v1036_v20 = vadd.f32 %v2485_v15, %v922_v55  ;;  %v924_v57 = vpop.f32.mrb[30].mxu1  ;;  %v1208_v9 = vunpack.c.l.bf16 %v1177_v11 }
 0x1ca   : > { %v1236_v60 = vadd.f32 %v1204_v46, %v1156_v52  ;;  %v1082_v61 = vmul.f32 %v2372_v27, %v1034_v54  ;;  %v1038_v23 = vadd.f32 %v2489_v16, %v924_v57  ;;  %v926_v62 = vpop.f32.mrb[31].mxu1 }
 0x1cb   : > { %v1633_v63 = vpack.c.bf16 %v1235_v56, %v1234_v51  ;;  %v1237_v1 = vadd.f32 %v1205_v49, %v1157_v58  ;;  %v1083_v24 = vmul.f32 %v2374_v29, %v1036_v20  ;;  %v1040_v2 = vadd.f32 %v2494_v32, %v926_v62 }
 0x1cc   : > { %v1126_v3 = vadd.f32 %v2376_v31, %v1082_v61  ;;  %v1084_v15 = vmul.f32 %v2372_v27, %v1038_v23  ;;  %v1209_v27 = vunpack.c.h.bf16 %v1177_v11 }
 0x1cd   : > { %1350 = vst [vmem:[%s2417_s15 + $0x60] sm:$0xff] %v1633_v63  ;;  %v1634_v5 = vpack.c.bf16 %v1237_v1, %v1236_v60  ;;  %v1127_v16 = vadd.f32 %v2383_v35, %v1083_v24  ;;  %v1085_v6 = vmul.f32 %v2374_v29, %v1040_v2 }
 0x1ce   : > { %v1158_v7 = vmax.f32 %v1126_v3, 0.0  ;;  %v1128_v8 = vadd.f32 %v2376_v31, %v1084_v15 }
 0x1cf   : > { %1351 = vst [vmem:[%s2417_s15 + $0x68] sm:$0xff] %v1634_v5  ;;  %v1159_v32 = vmax.f32 %v1127_v16, 0.0  ;;  %v1129_v0 = vadd.f32 %v2383_v35, %v1085_v6 }
 0x1d0   : > { %v1238_v12 = vadd.f32 %v1206_v4, %v1158_v7  ;;  %v1160_v10 = vmax.f32 %v1128_v8, 0.0 }
 0x1d1   : > { %v1239_v13 = vadd.f32 %v1207_v26, %v1159_v32  ;;  %v1161_v14 = vmax.f32 %v1129_v0, 0.0 }
 0x1d2   : > { %v1240_v29 = vadd.f32 %v1208_v9, %v1160_v10 }
 0x1d3   : > { %v1635_v18 = vpack.c.bf16 %v1239_v13, %v1238_v12  ;;  %v1241_v19 = vadd.f32 %v1209_v27, %v1161_v14 }
 0x1d5   : > { %1352 = vst [vmem:[%s2417_s15 + $0x70] sm:$0xff] %v1635_v18  ;;  %v1636_v31 = vpack.c.bf16 %v1241_v19, %v1240_v29 }
 0x1d7   : > { %1353 = vst [vmem:[%s2417_s15 + $0x78] sm:$0xff] %v1636_v31 }
 0x1d8   : > { %1964 = shalt.err (!%p1961_p9)
}
 0x1d9   : > { %s1965_s13 = scalar_lea.hbm %s2552_s14, 2048  ;;  %s1969_s1 = scalar_lea.hbm %s2610_s5, 4096 }
 0x1da   : > { %p1966_p10 = scmp.ne.s32.totalorder %s2552_s14, %s1965_s13  ;;  %p1970_p2 = scmp.lt.u32.totalorder %s2552_s14, %s2610_s5 }
 0x1db   : > { %p1971_p13 = scmp.lt.u32.totalorder %s1969_s1, %s1965_s13  ;;  %p1973_p7 = scmp.lt.u32.totalorder %s1965_s13, %s2552_s14 }
 0x1dc   : > { %p1967_p5 = pnand %p1966_p10, %p2635_p12 }
 0x1dd   : > { %p1972_p1 = por %p1971_p13, %p1970_p2 }
 0x1de   : > { %p1968_p8 = pneg %p1967_p5 }
 0x1df   : > { %p1974_p0 = por %p1973_p7, %p1972_p1 }
 0x1e1   : > { %p1975_p3 = pnand %p1974_p0, %p1968_p8 }
 0x1e3   : > { %1978 = shalt.err (!%p1975_p3)
}
 0x1e4   : > { %s2049_s6 = smov 128   ;;  %s2050_s16 = smov 256  }
 0x1e5   : > { %s2051_s10 = smov 8  }
 0x1e6   : > { %1680 = dma.vmem_to_hbm [thread:$0]  (%p2635_p12), %s2554_s17, 2048, %s2552_s14, %s1355_s21, %s2049_s6, %s2050_s16, %s2051_s10  }
 0x1e7 PF: > { %s1386_s27 = sand.u32 1, %s2017_s18   ;;  %p2636_p4 = scmp.ne.s32.totalorder %s2623_s9, 0 }
 0x1e8   : > { %p2637_p6 = scmp.ge.s32.totalorder %s2037_s23, 2  ;;  %s1387_s28 = scalar_lea.sflag [#allocation4], %s1386_s27 }
 0x1ea   : > { %p1694_p11 = pnand %p2637_p6, %p2636_p4 }
 0x1ec   : > { %2012 = dma.done.wait (!%p1694_p11), %s1387_s28, 2048  }
 0x1ed   : > { %2014 = vsyncadd (!%p1694_p11), %s1387_s28, 4294965248  ;;  %s22_s23 = sadd.s32 1, %s2037_s23   ;;  %s2638_s18 = smov %s2021_s19 }
 0x1ee   : > { %p19_p9 = scmp.ge.s32.totalorder %s22_s23, 4   ;;  %s2639_s19 = smov %s2025_s20 }
 0x1ef   : > { %s2640_s20 = smov %s2130_s30  ;;  %s2641_s21 = smov %s2033_s22 }
 0x1f0   : > { %s2642_s22 = smov %s2644_s24  ;;  %21 = sbr.rel (!%p19_p9) target bundleno = 9 (0x9), region = 108 }
 0x1f7   :  { %1392 = vsyncpa [#allocation3], 1 }
 0x1f8   :  { %1394 = vsyncpa [#allocation3 + $0x1], 1 }
 0x1f9   :  { %1395 = vsyncpa [#allocation6], 1 }
 0x1fa   :  { %1397 = vsyncpa [#allocation6 + $0x1], 1 }
 0x1fb   :  { %1398 = vsyncpa [#allocation4], 1 }
 0x1fc   :  { %1400 = vsyncpa [#allocation4 + $0x1], 1 }

</bundles_post_ra>
